<compile_context>
chip_gen: v6e
topology: v6e:2x2x1
jax: 0.10.0
libtpu: 0.0.40
codegen_flags: <defaults>
</compile_context>

<pallas_src>
import functools
import math

import numpy as np
import jax
import jax.numpy as jnp
from jax.experimental import pallas as pl
from jax.experimental.pallas import tpu as pltpu


def _rope_kernel(x_ref, cos_ref, sin_ref, pc_ref, ps_ref, o_ref):
    """RoPE on one (tm, tk) lane-dense tile of the (B*H, S*hd) slab.

    out = (x * cos_e) @ Pc + (x * sin_e) @ Ps
      cos_e/sin_e : interleave-expanded per-column cos/sin, (1, tk)      (VPU)
      Pc/Ps       : constant block-diagonal 0/+-1 matrices realising the
                    even/odd -> [half | half] layout, (tk, tk)           (MXU)
    Internal math in f32; I/O in the activation dtype (f32 or bf16).
    """
    x = x_ref[...].astype(jnp.float32)          # (tm, tk)
    xc = x * cos_ref[...]                       # (1, tk) broadcast over rows
    xs = x * sin_ref[...]
    out = (jnp.dot(xc, pc_ref[...], preferred_element_type=jnp.float32)
           + jnp.dot(xs, ps_ref[...], preferred_element_type=jnp.float32))
    o_ref[...] = out.astype(o_ref.dtype)


def _choose_tk(width: int, head_dim: int, target: int = 256) -> int:
    """Width tile: multiple of head_dim AND of 128 (lane-dense), ~target lanes."""
    unit = (head_dim * 128) // math.gcd(head_dim, 128)   # lcm(head_dim, 128)
    if unit >= width:
        return width                                     # full-width block
    tk = unit
    while tk < target and tk + unit <= width:
        tk += unit
    return tk


@functools.lru_cache(maxsize=None)
def _rope_tables(seq_len: int, head_dim: int, base: float, tk: int):
    """Host-side, computed once: cos/sin tables + (tk, tk) permutation tiles."""
    half = head_dim // 2
    exponent = np.arange(0, head_dim, 2, dtype=np.float64) / head_dim
    theta = (1.0 / (base ** exponent)).astype(np.float32)                 # (hd/2,)
    ang = np.arange(seq_len, dtype=np.float32)[:, None] * theta[None, :]  # (S, hd/2)
    # interleave-expand: lanes 2j and 2j+1 both carry cos(s, j) / sin(s, j)
    cos_e = np.repeat(np.cos(ang), 2, axis=-1).reshape(1, seq_len * head_dim)
    sin_e = np.repeat(np.sin(ang), 2, axis=-1).reshape(1, seq_len * head_dim)

    # Per-position permutation blocks (position-independent):
    #   out[:half] = x1*cos - x2*sin ; out[half:] = x1*sin + x2*cos
    # where x1 = x[2j], x2 = x[2j+1].
    j = np.arange(half)
    pc_blk = np.zeros((head_dim, head_dim), np.float32)
    ps_blk = np.zeros((head_dim, head_dim), np.float32)
    pc_blk[2 * j, j] = 1.0              # x1*cos -> first half
    pc_blk[2 * j + 1, half + j] = 1.0   # x2*cos -> second half
    ps_blk[2 * j + 1, j] = -1.0         # -x2*sin -> first half
    ps_blk[2 * j, half + j] = 1.0       # x1*sin -> second half

    reps = tk // head_dim               # tk is always a multiple of head_dim
    eye = np.eye(reps, dtype=np.float32)
    pc_tile = np.kron(eye, pc_blk)      # (tk, tk), reused for every width block
    ps_tile = np.kron(eye, ps_blk)
    return (cos_e.astype(np.float32), sin_e.astype(np.float32), pc_tile, ps_tile)


def rope(x: jax.Array, base: float = 10000.0, *,
         tm_max: int = 512, tk_target: int = 256) -> jax.Array:
    """Pallas RoPE matching the PyTorch reference (half-concat convention)."""
    B, H, S, hd = x.shape
    assert hd % 2 == 0, "head_dim must be even"
    rows = B * H
    width = S * hd

    tk = _choose_tk(width, hd, tk_target)
    # Row tile: full problem if small, else a 512-row tile (multiple of 8/16 so
    # both f32 and bf16 sublane tilings are happy).  A ragged last row block is
    # padded by Pallas; harmless for this purely element-parallel op.
    tm = rows if rows <= tm_max else tm_max

    cos_e, sin_e, pc_tile, ps_tile = _rope_tables(S, hd, float(base), tk)

    xf = x.reshape(rows, width)         # pure row-major reshape, no data movement
    grid = (pl.cdiv(rows, tm), pl.cdiv(width, tk))

    # Explicit VMEM budget (feedback: size against v7x's 64 MiB physical /
    # 32 MiB default scoped).  x/out double-buffered + both weight tiles + cos/sin.
    bpe = x.dtype.itemsize
    step_bytes = (2 * 2 * tm * tk * bpe      # x + out blocks, double-buffered
                  + 2 * 2 * tk * tk * 4      # Pc + Ps (constant index)
                  + 2 * 2 * tk * 4)          # cos + sin tiles
    vmem_limit = int(min(max(2 * step_bytes, 16 << 20), 32 << 20))

    out = pl.pallas_call(
        _rope_kernel,
        out_shape=jax.ShapeDtypeStruct((rows, width), x.dtype),
        grid=grid,
        in_specs=[
            pl.BlockSpec((tm, tk), lambda i, j: (i, j)),     # x   (streams)
            pl.BlockSpec((1, tk), lambda i, j: (0, j)),      # cos (per width tile)
            pl.BlockSpec((1, tk), lambda i, j: (0, j)),      # sin (per width tile)
            pl.BlockSpec((tk, tk), lambda i, j: (0, 0)),     # Pc  (fetched once)
            pl.BlockSpec((tk, tk), lambda i, j: (0, 0)),     # Ps  (fetched once)
        ],
        out_specs=pl.BlockSpec((tm, tk), lambda i, j: (i, j)),
        compiler_params=pltpu.CompilerParams(
            dimension_semantics=("parallel", "parallel"),
            vmem_limit_bytes=vmem_limit),
    )(xf, jnp.asarray(cos_e), jnp.asarray(sin_e),
      jnp.asarray(pc_tile), jnp.asarray(ps_tile))
    return out.reshape(B, H, S, hd)


def rope_reference(x: jax.Array, base: float = 10000.0) -> jax.Array:
    """Pure-JAX transcription of the PyTorch module (for verification)."""
    B, H, S, hd = x.shape
    theta = 1.0 / base ** (jnp.arange(0, hd, 2, dtype=jnp.float32) / hd)
    ang = jnp.arange(S, dtype=jnp.float32)[:, None] * theta[None, :]
    cos = jnp.cos(ang)[None, None]
    sin = jnp.sin(ang)[None, None]
    x1 = x[..., 0::2]
    x2 = x[..., 1::2]
    return jnp.concatenate([-x2 * sin + x1 * cos, x1 * sin + x2 * cos], axis=-1)


if __name__ == "__main__":
    key = jax.random.PRNGKey(0)
    B, H, S, HD = 2, 4, 8, 32            # (batch, n_heads, seq_len, head_dim)
    x = jax.random.normal(key, (B, H, S, HD), dtype=jnp.float32)

    rope_jit = jax.jit(rope)
    out = rope_jit(x)
    jax.block_until_ready(out)

    assert out.shape == (B, H, S, HD)
    assert bool(jnp.all(jnp.isfinite(out)))

    ref = rope_reference(x)
    max_err = float(jnp.max(jnp.abs(out - ref)))
    assert bool(jnp.allclose(out, ref, atol=1e-4, rtol=1e-4)), f"max_err={max_err}"

    # bf16 I/O path (the op is HBM-bound, so this halves wall-clock traffic);
    # verified against the f32 reference with a bf16-rounding tolerance.
    out_bf16 = jax.jit(rope)(x.astype(jnp.bfloat16))
    jax.block_until_ready(out_bf16)
    assert out_bf16.dtype == jnp.bfloat16
    bf16_err = float(jnp.max(jnp.abs(out_bf16.astype(jnp.float32) - ref)))
    assert bf16_err < 1e-1, f"bf16 max_err={bf16_err}"

    print("KERNEL_OK")
</pallas_src>

<mosaic_0001>
module attributes {stable_mosaic.version = 11 : i64} {
  func.func @_rope_kernel(%arg0: i32, %arg1: i32, %arg2: memref<8x256xf32, #tpu.memory_space<vmem>>, %arg3: memref<1x256xf32, #tpu.memory_space<vmem>>, %arg4: memref<1x256xf32, #tpu.memory_space<vmem>>, %arg5: memref<256x256xf32, #tpu.memory_space<vmem>>, %arg6: memref<256x256xf32, #tpu.memory_space<vmem>>, %arg7: memref<8x256xf32, #tpu.memory_space<vmem>>) attributes {dimension_semantics = [#tpu.dimension_semantics<parallel>, #tpu.dimension_semantics<parallel>], iteration_bounds = array<i64: 1, 1>, scalar_prefetch = 0 : i64, scratch_operands = 0 : i64, tpu.core_type = #tpu.core_type<tc>, window_params = [{transform_indices = @transform_0, window_bounds = array<i64: 8, 256>}, {transform_indices = @transform_1, window_bounds = array<i64: 1, 256>}, {transform_indices = @transform_2, window_bounds = array<i64: 1, 256>}, {pipeline_mode = #tpu.pipeline_mode<synchronous>, transform_indices = @transform_3, window_bounds = array<i64: 256, 256>}, {pipeline_mode = #tpu.pipeline_mode<synchronous>, transform_indices = @transform_4, window_bounds = array<i64: 256, 256>}, {transform_indices = @transform_5, window_bounds = array<i64: 8, 256>}]} {
    %c0 = arith.constant 0 : index
    %c0_0 = arith.constant 0 : index
    %0 = vector.load %arg2[%c0, %c0_0] : memref<8x256xf32, #tpu.memory_space<vmem>>, vector<8x256xf32>
    %c0_1 = arith.constant 0 : index
    %c0_2 = arith.constant 0 : index
    %1 = vector.load %arg3[%c0_1, %c0_2] : memref<1x256xf32, #tpu.memory_space<vmem>>, vector<1x256xf32>
    %2 = vector.broadcast %1 : vector<1x256xf32> to vector<8x256xf32>
    %3 = arith.mulf %0, %2 : vector<8x256xf32>
    %c0_3 = arith.constant 0 : index
    %c0_4 = arith.constant 0 : index
    %4 = vector.load %arg4[%c0_3, %c0_4] : memref<1x256xf32, #tpu.memory_space<vmem>>, vector<1x256xf32>
    %5 = vector.broadcast %4 : vector<1x256xf32> to vector<8x256xf32>
    %6 = arith.mulf %0, %5 : vector<8x256xf32>
    %c0_5 = arith.constant 0 : index
    %c0_6 = arith.constant 0 : index
    %7 = vector.load %arg5[%c0_5, %c0_6] : memref<256x256xf32, #tpu.memory_space<vmem>>, vector<256x256xf32>
    %cst = arith.constant dense<0.000000e+00> : vector<8x256xf32>
    %8 = tpu.matmul %3, %7, %cst {dimension_numbers = #tpu.dot_dimension_numbers<[1], [0], [0], [1], [0, 0, 1, 1], [], []>} : vector<8x256xf32>, vector<256x256xf32>, vector<8x256xf32> -> vector<8x256xf32>
    %c0_7 = arith.constant 0 : index
    %c0_8 = arith.constant 0 : index
    %9 = vector.load %arg6[%c0_7, %c0_8] : memref<256x256xf32, #tpu.memory_space<vmem>>, vector<256x256xf32>
    %cst_9 = arith.constant dense<0.000000e+00> : vector<8x256xf32>
    %10 = tpu.matmul %6, %9, %cst_9 {dimension_numbers = #tpu.dot_dimension_numbers<[1], [0], [0], [1], [0, 0, 1, 1], [], []>} : vector<8x256xf32>, vector<256x256xf32>, vector<8x256xf32> -> vector<8x256xf32>
    %11 = arith.addf %8, %10 : vector<8x256xf32>
    %c0_10 = arith.constant 0 : index
    %c0_11 = arith.constant 0 : index
    %12 = vector.load %arg7[%c0_10, %c0_11] : memref<8x256xf32, #tpu.memory_space<vmem>>, vector<8x256xf32>
    tpu.vector_store %arg7[%c0_10, %c0_11], %11 {strides = array<i32>} : memref<8x256xf32, #tpu.memory_space<vmem>>, vector<8x256xf32>,
    return
  }
  func.func @transform_0(%arg0: i32, %arg1: i32) -> (i32, i32) {
    %c0_i32 = arith.constant 0 : i32
    return %arg0, %arg1 : i32, i32
  }
  func.func @transform_1(%arg0: i32, %arg1: i32) -> (i32, i32) {
    %c0_i32 = arith.constant 0 : i32
    %c0_i32_0 = arith.constant 0 : i32
    return %c0_i32, %arg1 : i32, i32
  }
  func.func @transform_2(%arg0: i32, %arg1: i32) -> (i32, i32) {
    %c0_i32 = arith.constant 0 : i32
    %c0_i32_0 = arith.constant 0 : i32
    return %c0_i32, %arg1 : i32, i32
  }
  func.func @transform_3(%arg0: i32, %arg1: i32) -> (i32, i32) {
    %c0_i32 = arith.constant 0 : i32
    %c0_i32_0 = arith.constant 0 : i32
    %c0_i32_1 = arith.constant 0 : i32
    return %c0_i32, %c0_i32_0 : i32, i32
  }
  func.func @transform_4(%arg0: i32, %arg1: i32) -> (i32, i32) {
    %c0_i32 = arith.constant 0 : i32
    %c0_i32_0 = arith.constant 0 : i32
    %c0_i32_1 = arith.constant 0 : i32
    return %c0_i32, %c0_i32_0 : i32, i32
  }
  func.func @transform_5(%arg0: i32, %arg1: i32) -> (i32, i32) {
    %c0_i32 = arith.constant 0 : i32
    return %arg0, %arg1 : i32, i32
  }
}

</mosaic_0001>

<bundles_post_ra>
// kernel: rope.1
= control target key start
LH: loop header
LB: loop body
LE: loop exit
PB: predicated region body
PF: predicated region fallthrough
CT: control target
= control target key end

     0   :  { %10 = vsyncpa [#allocation3], 0  ;;  %s462_s0 = inlined_call_operand.vmem [shape: f32[8,256], index: 0, kind: input, shape index: {}]   ;;  %s463_s1 = inlined_call_operand.vmem [shape: f32[1,256], index: 1, kind: input, shape index: {}]   ;;  %s464_s2 = inlined_call_operand.vmem [shape: f32[1,256], index: 2, kind: input, shape index: {}]   ;;  %s465_s3 = inlined_call_operand.hbm [shape: f32[256,256], index: 3, kind: input, shape index: {}]   ;;  %s466_s4 = inlined_call_operand.hbm [shape: f32[256,256], index: 4, kind: input, shape index: {}]   ;;  %s467_s5 = inlined_call_operand.vmem [shape: f32[8,256], index: 5, kind: output, shape index: {}]  }
   0x1   :  { %11 = vsyncpa [#allocation5], 0  ;;  %s404_s18 = smov [#allocation2]  }
   0x2   :  { %s23_s19 = sshll.u32 %s404_s18, 4  ;;  %s24_s19 = int_to_ptr.vmem [resolvable:$true] %s23_s19 }
   0x3   :  { %s368_s20 = scalar_lea.vmem %s24_s19, 8192  ;;  %p373_p1 = scmp.lt.s32.totalorder %s24_s19, %s24_s19 }
   0x4   :  { %p369_p0 = scmp.ne.s32.totalorder %s24_s19, %s368_s20  ;;  %p374_p2 = scmp.lt.s32.totalorder %s368_s20, %s368_s20 }
   0x6   :  { %p375_p3 = por %p374_p2, %p373_p1 }
   0x8   :  { %p376_p4 = pnand %p375_p3, %p369_p0 }
   0xa   :  { %379 = shalt.err (!%p376_p4)
}
   0xb   :  { %s405_s21 = smov 256   ;;  %s406_s22 = smov 16  }
   0xc   :  { %29 = dma.hbm_to_vmem [thread:$0]  %s465_s3, 8192, %s24_s19, [#allocation3], %s405_s21, %s405_s21, %s406_s22  }
   0xd   :  { %s407_s25 = smov [#allocation4]  }
   0xe   :  { %s35_s26 = sshll.u32 %s407_s25, 4  ;;  %s36_s26 = int_to_ptr.vmem [resolvable:$true] %s35_s26 }
   0xf   :  { %s388_s27 = scalar_lea.vmem %s36_s26, 8192  ;;  %p393_p6 = scmp.lt.s32.totalorder %s36_s26, %s36_s26 }
  0x10   :  { %p389_p5 = scmp.ne.s32.totalorder %s36_s26, %s388_s27  ;;  %p394_p7 = scmp.lt.s32.totalorder %s388_s27, %s388_s27 }
  0x12   :  { %p395_p8 = por %p394_p7, %p393_p6 }
  0x14   :  { %p396_p9 = pnand %p395_p8, %p389_p5 }
  0x16   :  { %399 = shalt.err (!%p396_p9)
}
  0x17   :  { %41 = dma.hbm_to_vmem [thread:$0]  %s466_s4, 8192, %s36_s26, [#allocation5], %s405_s21, %s405_s21, %s406_s22  }
  0x18   :  { %400 = dma.done.wait [#allocation3], 8192  }
  0x19   :  { %401 = vsyncadd [#allocation3], 4294959104 }
  0x1a   :  { %402 = dma.done.wait [#allocation5], 8192  }
  0x1b   :  { %403 = vsyncadd [#allocation5], 4294959104  ;;  %v173_v0 = vld [vmem:[#allocation4 + $0xf8] sm:$0xff]  ;;  %v172_v2 = vld [vmem:[#allocation4 + $0xf0] sm:$0xff] }
  0x1c   :  { %v109_v1 = vld [vmem:[#allocation2 + $0xf8] sm:$0xff]  ;;  %206 = vmatprep.subr.mxu0 %v173_v0  ;;  %v108_v3 = vld [vmem:[#allocation2 + $0xf0] sm:$0xff]  ;;  %v171_v4 = vld [vmem:[#allocation4 + $0xe8] sm:$0xff] }
  0x1d   :  { %277 = vmatprep.subr.mxu1 %v109_v1  ;;  %v107_v5 = vld [vmem:[#allocation2 + $0xe8] sm:$0xff]  ;;  %207 = vmatpush1.msra.mxu0 %v172_v2  ;;  %v170_v6 = vld [vmem:[#allocation4 + $0xe0] sm:$0xff]  ;;  %v169_v8 = vld [vmem:[#allocation4 + $0xd8] sm:$0xff] }
  0x1e   :  { %278 = vmatpush1.msra.mxu1 %v108_v3  ;;  %v106_v7 = vld [vmem:[#allocation2 + $0xe0] sm:$0xff]  ;;  %208 = vmatprep.subr.mxu0 %v171_v4  ;;  %v105_v9 = vld [vmem:[#allocation2 + $0xd8] sm:$0xff]  ;;  %v168_v10 = vld [vmem:[#allocation4 + $0xd0] sm:$0xff] }
  0x1f   :  { %279 = vmatprep.subr.mxu1 %v107_v5  ;;  %v104_v11 = vld [vmem:[#allocation2 + $0xd0] sm:$0xff]  ;;  %209 = vmatpush1.msra.mxu0 %v170_v6  ;;  %v167_v12 = vld [vmem:[#allocation4 + $0xc8] sm:$0xff]  ;;  %v166_v14 = vld [vmem:[#allocation4 + $0xc0] sm:$0xff] }
  0x20   :  { %280 = vmatpush1.msra.mxu1 %v106_v7  ;;  %v103_v13 = vld [vmem:[#allocation2 + $0xc8] sm:$0xff]  ;;  %210 = vmatprep.subr.mxu0 %v169_v8  ;;  %v102_v15 = vld [vmem:[#allocation2 + $0xc0] sm:$0xff]  ;;  %v165_v16 = vld [vmem:[#allocation4 + $0xb8] sm:$0xff] }
  0x21   :  { %281 = vmatprep.subr.mxu1 %v105_v9  ;;  %211 = vmatpush1.msra.mxu0 %v168_v10  ;;  %v101_v17 = vld [vmem:[#allocation2 + $0xb8] sm:$0xff]  ;;  %v164_v18 = vld [vmem:[#allocation4 + $0xb0] sm:$0xff]  ;;  %v163_v20 = vld [vmem:[#allocation4 + $0xa8] sm:$0xff] }
  0x22   :  { %282 = vmatpush1.msra.mxu1 %v104_v11  ;;  %212 = vmatprep.subr.mxu0 %v167_v12  ;;  %v100_v19 = vld [vmem:[#allocation2 + $0xb0] sm:$0xff]  ;;  %v99_v21 = vld [vmem:[#allocation2 + $0xa8] sm:$0xff]  ;;  %v162_v22 = vld [vmem:[#allocation4 + $0xa0] sm:$0xff] }
  0x23   :  { %283 = vmatprep.subr.mxu1 %v103_v13  ;;  %213 = vmatpush1.msra.mxu0 %v166_v14  ;;  %v98_v23 = vld [vmem:[#allocation2 + $0xa0] sm:$0xff]  ;;  %v161_v24 = vld [vmem:[#allocation4 + $0x98] sm:$0xff]  ;;  %v160_v26 = vld [vmem:[#allocation4 + $0x90] sm:$0xff] }
  0x24   :  { %284 = vmatpush1.msra.mxu1 %v102_v15  ;;  %214 = vmatprep.subr.mxu0 %v165_v16  ;;  %v97_v25 = vld [vmem:[#allocation2 + $0x98] sm:$0xff]  ;;  %v96_v27 = vld [vmem:[#allocation2 + $0x90] sm:$0xff]  ;;  %v159_v28 = vld [vmem:[#allocation4 + $0x88] sm:$0xff] }
  0x25   :  { %285 = vmatprep.subr.mxu1 %v101_v17  ;;  %215 = vmatpush1.msra.mxu0 %v164_v18  ;;  %v95_v29 = vld [vmem:[#allocation2 + $0x88] sm:$0xff]  ;;  %v158_v30 = vld [vmem:[#allocation4 + $0x80] sm:$0xff]  ;;  %v157_v32 = vld [vmem:[#allocation4 + $0x78] sm:$0xff] }
  0x26   :  { %286 = vmatpush1.msra.mxu1 %v100_v19  ;;  %216 = vmatprep.subr.mxu0 %v163_v20  ;;  %v94_v31 = vld [vmem:[#allocation2 + $0x80] sm:$0xff]  ;;  %v93_v33 = vld [vmem:[#allocation2 + $0x78] sm:$0xff]  ;;  %v156_v34 = vld [vmem:[#allocation4 + $0x70] sm:$0xff] }
  0x27   :  { %287 = vmatprep.subr.mxu1 %v99_v21  ;;  %217 = vmatpush1.msra.mxu0 %v162_v22  ;;  %v92_v35 = vld [vmem:[#allocation2 + $0x70] sm:$0xff]  ;;  %v155_v36 = vld [vmem:[#allocation4 + $0x68] sm:$0xff]  ;;  %v154_v38 = vld [vmem:[#allocation4 + $0x60] sm:$0xff] }
  0x28   :  { %288 = vmatpush1.msra.mxu1 %v98_v23  ;;  %218 = vmatprep.subr.mxu0 %v161_v24  ;;  %v91_v37 = vld [vmem:[#allocation2 + $0x68] sm:$0xff]  ;;  %v90_v39 = vld [vmem:[#allocation2 + $0x60] sm:$0xff]  ;;  %v153_v40 = vld [vmem:[#allocation4 + $0x58] sm:$0xff] }
  0x29   :  { %289 = vmatprep.subr.mxu1 %v97_v25  ;;  %219 = vmatpush1.msra.mxu0 %v160_v26  ;;  %v89_v41 = vld [vmem:[#allocation2 + $0x58] sm:$0xff]  ;;  %v152_v42 = vld [vmem:[#allocation4 + $0x50] sm:$0xff]  ;;  %v151_v44 = vld [vmem:[#allocation4 + $0x48] sm:$0xff] }
  0x2a   :  { %290 = vmatpush1.msra.mxu1 %v96_v27  ;;  %220 = vmatprep.subr.mxu0 %v159_v28  ;;  %v88_v43 = vld [vmem:[#allocation2 + $0x50] sm:$0xff]  ;;  %v87_v45 = vld [vmem:[#allocation2 + $0x48] sm:$0xff]  ;;  %v150_v46 = vld [vmem:[#allocation4 + $0x40] sm:$0xff] }
  0x2b   :  { %291 = vmatprep.subr.mxu1 %v95_v29  ;;  %221 = vmatpush1.msra.mxu0 %v158_v30  ;;  %v86_v47 = vld [vmem:[#allocation2 + $0x40] sm:$0xff]  ;;  %v149_v48 = vld [vmem:[#allocation4 + $0x38] sm:$0xff]  ;;  %v148_v50 = vld [vmem:[#allocation4 + $0x30] sm:$0xff]  ;;  %v52_v30 = vlaneseq }
  0x2c   :  { %292 = vmatpush1.msra.mxu1 %v94_v31  ;;  %222 = vmatprep.subr.mxu0 %v157_v32  ;;  %v85_v49 = vld [vmem:[#allocation2 + $0x38] sm:$0xff]  ;;  %v84_v51 = vld [vmem:[#allocation2 + $0x30] sm:$0xff]  ;;  %v147_v52 = vld [vmem:[#allocation4 + $0x28] sm:$0xff] }
  0x2d   :  { %293 = vmatprep.subr.mxu1 %v93_v33  ;;  %223 = vmatpush1.msra.mxu0 %v156_v34  ;;  %v83_v53 = vld [vmem:[#allocation2 + $0x28] sm:$0xff]  ;;  %v146_v54 = vld [vmem:[#allocation4 + $0x20] sm:$0xff]  ;;  %v145_v56 = vld [vmem:[#allocation4 + $0x18] sm:$0xff] }
  0x2e   :  { %294 = vmatpush1.msra.mxu1 %v92_v35  ;;  %224 = vmatprep.subr.mxu0 %v155_v36  ;;  %v82_v55 = vld [vmem:[#allocation2 + $0x20] sm:$0xff]  ;;  %v81_v57 = vld [vmem:[#allocation2 + $0x18] sm:$0xff]  ;;  %v144_v58 = vld [vmem:[#allocation4 + $0x10] sm:$0xff] }
  0x2f   :  { %295 = vmatprep.subr.mxu1 %v91_v37  ;;  %225 = vmatpush1.msra.mxu0 %v154_v38  ;;  %v80_v59 = vld [vmem:[#allocation2 + $0x10] sm:$0xff]  ;;  %v143_v60 = vld [vmem:[#allocation4 + $0x8] sm:$0xff]  ;;  %v142_v62 = vld [vmem:[#allocation4] sm:$0xff] }
  0x30   :  { %296 = vmatpush1.msra.mxu1 %v90_v39  ;;  %226 = vmatprep.subr.mxu0 %v153_v40  ;;  %v79_v61 = vld [vmem:[#allocation2 + $0x8] sm:$0xff]  ;;  %v78_v63 = vld [vmem:[#allocation2] sm:$0xff]  ;;  %v205_v0 = vld [vmem:[#allocation4 + $0x1f8] sm:$0xff]  ;;  %v53_v39 = vshrl.u32 %v52_v30, 7 }
  0x31   :  { %297 = vmatprep.subr.mxu1 %v89_v41  ;;  %227 = vmatpush1.msra.mxu0 %v152_v42  ;;  %v141_v1 = vld [vmem:[#allocation2 + $0x1f8] sm:$0xff]  ;;  %v204_v2 = vld [vmem:[#allocation4 + $0x1f0] sm:$0xff]  ;;  %v203_v4 = vld [vmem:[#allocation4 + $0x1e8] sm:$0xff] }
  0x32   :  { %298 = vmatpush1.msra.mxu1 %v88_v43  ;;  %228 = vmatprep.subr.mxu0 %v151_v44  ;;  %v140_v3 = vld [vmem:[#allocation2 + $0x1f0] sm:$0xff]  ;;  %v139_v5 = vld [vmem:[#allocation2 + $0x1e8] sm:$0xff]  ;;  %v202_v6 = vld [vmem:[#allocation4 + $0x1e0] sm:$0xff] }
  0x33   :  { %299 = vmatprep.subr.mxu1 %v87_v45  ;;  %229 = vmatpush1.msra.mxu0 %v150_v46  ;;  %v138_v7 = vld [vmem:[#allocation2 + $0x1e0] sm:$0xff]  ;;  %v201_v8 = vld [vmem:[#allocation4 + $0x1d8] sm:$0xff]  ;;  %v200_v10 = vld [vmem:[#allocation4 + $0x1d0] sm:$0xff] }
  0x34   :  { %300 = vmatpush1.msra.mxu1 %v86_v47  ;;  %230 = vmatprep.subr.mxu0 %v149_v48  ;;  %v137_v9 = vld [vmem:[#allocation2 + $0x1d8] sm:$0xff]  ;;  %v136_v11 = vld [vmem:[#allocation2 + $0x1d0] sm:$0xff]  ;;  %v199_v12 = vld [vmem:[#allocation4 + $0x1c8] sm:$0xff]  ;;  %v58_v48 = vsub.s32 1, %v53_v39 }
  0x35   :  { %301 = vmatprep.subr.mxu1 %v85_v49  ;;  %231 = vmatpush1.msra.mxu0 %v148_v50  ;;  %v135_v13 = vld [vmem:[#allocation2 + $0x1c8] sm:$0xff]  ;;  %v198_v14 = vld [vmem:[#allocation4 + $0x1c0] sm:$0xff]  ;;  %v197_v16 = vld [vmem:[#allocation4 + $0x1b8] sm:$0xff] }
  0x36   :  { %302 = vmatpush1.msra.mxu1 %v84_v51  ;;  %232 = vmatprep.subr.mxu0 %v147_v52  ;;  %v134_v15 = vld [vmem:[#allocation2 + $0x1c0] sm:$0xff]  ;;  %v133_v17 = vld [vmem:[#allocation2 + $0x1b8] sm:$0xff]  ;;  %v196_v18 = vld [vmem:[#allocation4 + $0x1b0] sm:$0xff] }
  0x37   :  { %303 = vmatprep.subr.mxu1 %v83_v53  ;;  %233 = vmatpush1.msra.mxu0 %v146_v54  ;;  %v132_v19 = vld [vmem:[#allocation2 + $0x1b0] sm:$0xff]  ;;  %v195_v20 = vld [vmem:[#allocation4 + $0x1a8] sm:$0xff]  ;;  %v194_v22 = vld [vmem:[#allocation4 + $0x1a0] sm:$0xff]  ;;  %v54_v54 = vsub.s32 0, %v53_v39 }
  0x38   :  { %304 = vmatpush1.msra.mxu1 %v82_v55  ;;  %234 = vmatprep.subr.mxu0 %v145_v56  ;;  %v131_v21 = vld [vmem:[#allocation2 + $0x1a8] sm:$0xff]  ;;  %v130_v23 = vld [vmem:[#allocation2 + $0x1a0] sm:$0xff]  ;;  %v193_v24 = vld [vmem:[#allocation4 + $0x198] sm:$0xff] }
  0x39   :  { %305 = vmatprep.subr.mxu1 %v81_v57  ;;  %235 = vmatpush1.msra.mxu0 %v144_v58  ;;  %v129_v25 = vld [vmem:[#allocation2 + $0x198] sm:$0xff]  ;;  %v192_v26 = vld [vmem:[#allocation4 + $0x190] sm:$0xff]  ;;  %v191_v28 = vld [vmem:[#allocation4 + $0x188] sm:$0xff] }
  0x3a   :  { %306 = vmatpush1.msra.mxu1 %v80_v59  ;;  %236 = vmatprep.subr.mxu0 %v143_v60  ;;  %v128_v27 = vld [vmem:[#allocation2 + $0x190] sm:$0xff]  ;;  %v127_v29 = vld [vmem:[#allocation2 + $0x188] sm:$0xff]  ;;  %v190_v31 = vld [vmem:[#allocation4 + $0x180] sm:$0xff] }
  0x3b   :  { %307 = vmatprep.subr.mxu1 %v79_v61  ;;  %237 = vmatpush1.msra.mxu0 %v142_v62  ;;  %v126_v32 = vld [vmem:[#allocation2 + $0x180] sm:$0xff]  ;;  %v189_v33 = vld [vmem:[#allocation4 + $0x178] sm:$0xff]  ;;  %v188_v35 = vld [vmem:[#allocation4 + $0x170] sm:$0xff] }
  0x3c   :  { %308 = vmatpush1.msra.mxu1 %v78_v63  ;;  %238 = vmatprep.subr.mxu0 %v205_v0  ;;  %v125_v34 = vld [vmem:[#allocation2 + $0x178] sm:$0xff]  ;;  %v124_v36 = vld [vmem:[#allocation2 + $0x170] sm:$0xff]  ;;  %v187_v37 = vld [vmem:[#allocation4 + $0x168] sm:$0xff] }
  0x3d   :  { %309 = vmatprep.subr.mxu1 %v141_v1  ;;  %239 = vmatpush2.msra.mxu0 %v204_v2  ;;  %v123_v38 = vld [vmem:[#allocation2 + $0x168] sm:$0xff]  ;;  %v186_v40 = vld [vmem:[#allocation4 + $0x160] sm:$0xff]  ;;  %v185_v42 = vld [vmem:[#allocation4 + $0x158] sm:$0xff] }
  0x3e   :  { %310 = vmatpush2.msra.mxu1 %v140_v3  ;;  %240 = vmatprep.subr.mxu0 %v203_v4  ;;  %v122_v41 = vld [vmem:[#allocation2 + $0x160] sm:$0xff]  ;;  %v121_v43 = vld [vmem:[#allocation2 + $0x158] sm:$0xff]  ;;  %v184_v44 = vld [vmem:[#allocation4 + $0x150] sm:$0xff] }
  0x3f   :  { %311 = vmatprep.subr.mxu1 %v139_v5  ;;  %241 = vmatpush2.msra.mxu0 %v202_v6  ;;  %v120_v45 = vld [vmem:[#allocation2 + $0x150] sm:$0xff]  ;;  %v183_v46 = vld [vmem:[#allocation4 + $0x148] sm:$0xff]  ;;  %v182_v49 = vld [vmem:[#allocation4 + $0x140] sm:$0xff] }
  0x40   :  { %312 = vmatpush2.msra.mxu1 %v138_v7  ;;  %242 = vmatprep.subr.mxu0 %v201_v8  ;;  %v119_v47 = vld [vmem:[#allocation2 + $0x148] sm:$0xff]  ;;  %v118_v50 = vld [vmem:[#allocation2 + $0x140] sm:$0xff]  ;;  %v181_v52 = vld [vmem:[#allocation4 + $0x138] sm:$0xff] }
  0x41   :  { %313 = vmatprep.subr.mxu1 %v137_v9  ;;  %243 = vmatpush2.msra.mxu0 %v200_v10  ;;  %v64_v51 = vld [vmem:[%s464_s2] sm:$0x3]  ;;  %v117_v53 = vld [vmem:[#allocation2 + $0x138] sm:$0xff]  ;;  %v180_v56 = vld [vmem:[#allocation4 + $0x130] sm:$0xff] }
  0x42   :  { %314 = vmatpush2.msra.mxu1 %v136_v11  ;;  %244 = vmatprep.subr.mxu0 %v199_v12  ;;  %v50_v55 = vld [vmem:[%s463_s1] sm:$0x3]  ;;  %v116_v57 = vld [vmem:[#allocation2 + $0x130] sm:$0xff]  ;;  %v179_v58 = vld [vmem:[#allocation4 + $0x128] sm:$0xff]  ;;  %v73_v60 = vrot.slane %v64_v51, %v58_v48  ;;  %v69_v3 = vrot.slane %v64_v51, %v54_v54 }
  0x43   :  { %315 = vmatprep.subr.mxu1 %v135_v13  ;;  %245 = vmatpush2.msra.mxu0 %v198_v14  ;;  %v115_v59 = vld [vmem:[#allocation2 + $0x128] sm:$0xff]  ;;  %v178_v61 = vld [vmem:[#allocation4 + $0x120] sm:$0xff]  ;;  %v59_v0 = vrot.slane %v50_v55, %v58_v48  ;;  %v177_v1 = vld [vmem:[#allocation4 + $0x118] sm:$0xff]  ;;  %v55_v4 = vrot.slane %v50_v55, %v54_v54 }
  0x44   :  { %316 = vmatpush2.msra.mxu1 %v134_v15  ;;  %246 = vmatprep.subr.mxu0 %v197_v16  ;;  %v114_v62 = vld [vmem:[#allocation2 + $0x120] sm:$0xff]  ;;  %v49_v63 = vld [vmem:[%s462_s0 + $0x8] sm:$0xff]  ;;  %v113_v2 = vld [vmem:[#allocation2 + $0x118] sm:$0xff] }
  0x45   :  { %317 = vmatprep.subr.mxu1 %v133_v17  ;;  %247 = vmatpush2.msra.mxu0 %v196_v18  ;;  %v176_v5 = vld [vmem:[#allocation4 + $0x110] sm:$0xff]  ;;  %v48_v7 = vld [vmem:[%s462_s0] sm:$0xff]  ;;  %v175_v8 = vld [vmem:[#allocation4 + $0x108] sm:$0xff]  ;;  %v77_v10 = vmul.f32 %v73_v60, %v49_v63  ;;  %v63_v12 = vmul.f32 %v59_v0, %v49_v63 }
  0x46   :  { %318 = vmatpush2.msra.mxu1 %v132_v19  ;;  %248 = vmatprep.subr.mxu0 %v195_v20  ;;  %v112_v6 = vld [vmem:[#allocation2 + $0x110] sm:$0xff]  ;;  %v111_v9 = vld [vmem:[#allocation2 + $0x108] sm:$0xff]  ;;  %v174_v11 = vld [vmem:[#allocation4 + $0x100] sm:$0xff]  ;;  %v76_v14 = vmul.f32 %v69_v3, %v48_v7  ;;  %v62_v15 = vmul.f32 %v55_v4, %v48_v7 }
  0x47   :  { %319 = vmatprep.subr.mxu1 %v131_v21  ;;  %249 = vmatpush2.msra.mxu0 %v194_v22  ;;  %v110_v13 = vld [vmem:[#allocation2 + $0x100] sm:$0xff] }
  0x48   :  { %320 = vmatpush2.msra.mxu1 %v130_v23  ;;  %250 = vmatprep.subr.mxu0 %v193_v24 }
  0x49   :  { %321 = vmatprep.subr.mxu1 %v129_v25  ;;  %251 = vmatpush2.msra.mxu0 %v192_v26 }
  0x4a   :  { %322 = vmatpush2.msra.mxu1 %v128_v27  ;;  %252 = vmatprep.subr.mxu0 %v191_v28 }
  0x4b   :  { %323 = vmatprep.subr.mxu1 %v127_v29  ;;  %253 = vmatpush2.msra.mxu0 %v190_v31 }
  0x4c   :  { %324 = vmatpush2.msra.mxu1 %v126_v32  ;;  %254 = vmatprep.subr.mxu0 %v189_v33 }
  0x4d   :  { %325 = vmatprep.subr.mxu1 %v125_v34  ;;  %255 = vmatpush2.msra.mxu0 %v188_v35 }
  0x4e   :  { %326 = vmatpush2.msra.mxu1 %v124_v36  ;;  %256 = vmatprep.subr.mxu0 %v187_v37 }
  0x4f   :  { %327 = vmatprep.subr.mxu1 %v123_v38  ;;  %257 = vmatpush2.msra.mxu0 %v186_v40 }
  0x50   :  { %328 = vmatpush2.msra.mxu1 %v122_v41  ;;  %258 = vmatprep.subr.mxu0 %v185_v42 }
  0x51   :  { %329 = vmatprep.subr.mxu1 %v121_v43  ;;  %259 = vmatpush2.msra.mxu0 %v184_v44 }
  0x52   :  { %330 = vmatpush2.msra.mxu1 %v120_v45  ;;  %260 = vmatprep.subr.mxu0 %v183_v46 }
  0x53   :  { %331 = vmatprep.subr.mxu1 %v119_v47  ;;  %261 = vmatpush2.msra.mxu0 %v182_v49 }
  0x54   :  { %332 = vmatpush2.msra.mxu1 %v118_v50  ;;  %262 = vmatprep.subr.mxu0 %v181_v52 }
  0x55   :  { %333 = vmatprep.subr.mxu1 %v117_v53  ;;  %263 = vmatpush2.msra.mxu0 %v180_v56 }
  0x56   :  { %334 = vmatpush2.msra.mxu1 %v116_v57  ;;  %264 = vmatprep.subr.mxu0 %v179_v58 }
  0x57   :  { %335 = vmatprep.subr.mxu1 %v115_v59  ;;  %265 = vmatpush2.msra.mxu0 %v178_v61 }
  0x58   :  { %336 = vmatpush2.msra.mxu1 %v114_v62  ;;  %266 = vmatprep.subr.mxu0 %v177_v1 }
  0x59   :  { %337 = vmatprep.subr.mxu1 %v113_v2  ;;  %267 = vmatpush2.msra.mxu0 %v176_v5 }
  0x5a   :  { %338 = vmatpush2.msra.mxu1 %v112_v6  ;;  %268 = vmatprep.subr.mxu0 %v175_v8 }
  0x5b   :  { %339 = vmatprep.subr.mxu1 %v111_v9  ;;  %269 = vmatpush2.msra.mxu0 %v174_v11 }
  0x5c   :  { %270 = vmatprep.mubr.f32.mxu0 %v77_v10  ;;  %340 = vmatpush2.msra.mxu1 %v110_v13 }
  0x5d   :  { %341 = vmatprep.mubr.f32.mxu1 %v63_v12  ;;  %271 = vmatmul.mubr.f32.vlgmr.msra.gmra.mxu0 %v76_v14 }
  0x5e   :  { %342 = vmatmul.mubr.f32.vlgmr.msra.gmra.mxu1 %v62_v15 }
 0x11d   :  { %v272_v16 = vpop.f32.mrf.mxu0 }
 0x11e   :  { %v343_v17 = vpop.f32.mrf.mxu1 }
 0x11f   :  { %v344_v18 = vadd.f32 %v343_v17, %v272_v16  ;;  %v274_v19 = vpop.f32.mrf.mxu0 }
 0x120   :  { %v345_v20 = vpop.f32.mrf.mxu1 }
 0x121   :  { %348 = vst [vmem:[%s467_s5] sm:$0xff] %v344_v18  ;;  %v346_v21 = vadd.f32 %v345_v20, %v274_v19 }
 0x123   :  { %349 = vst [vmem:[%s467_s5 + $0x8] sm:$0xff] %v346_v21 }
 0x124   :  { %354 = vsyncpa [#allocation3], 1 }
 0x125   :  { %355 = vsyncpa [#allocation5], 1 }

</bundles_post_ra>
